<compile_context>
chip_gen: v7x
topology: tpu7x:2x2x1
jax: 0.10.0
libtpu: 0.0.40
codegen_flags: <defaults>
</compile_context>

<pallas_src>
import jax
import jax.numpy as jnp
from jax import lax
from jax.experimental import pallas as pl
from jax.experimental.pallas import tpu as pltpu


def get_same_padding(kernel_size: int) -> int:
    assert isinstance(kernel_size, int)
    assert kernel_size % 2 > 0, "kernel size should be odd number"
    return kernel_size // 2


# ----------------------------- Pallas matmul -----------------------------

def _conv_mm_kernel(w_ref, x_ref, o_ref):
    # w_ref: (O, K) bf16 (resident), x_ref: (K, TM) bf16, o_ref: (O, TM) f32
    o_ref[...] = jnp.dot(
        w_ref[...], x_ref[...], preferred_element_type=jnp.float32
    ).astype(o_ref.dtype)


def _round_up(x: int, m: int) -> int:
    return ((x + m - 1) // m) * m


def _choose_tile_m(O: int, K: int, M: int, *,
                   vmem_budget_bytes: int = 24 * 1024 * 1024,
                   max_tile_m: int = 2048) -> int:
    """Pick the M (lane) tile width from a per-TensorCore VMEM budget.

    Working set ~= 2*O*K*2B   (bf16 weight, conservatively double-buffered)
                 + 2*K*tm*2B  (streamed bf16 im2col tile, double-buffered)
                 + 2*O*tm*4B  (f32 output tile, double-buffered).
    The budget is kept well under 64 MiB so the same sizing is safe on v7x
    (64 MiB per TC) as well as v5e/v6e (128 MiB).
    """
    bytes_fixed = 2 * O * K * 2
    bytes_per_m = 2 * (K * 2 + O * 4)
    tile = (vmem_budget_bytes - bytes_fixed) // max(bytes_per_m, 1)
    tile = max(128, min(max_tile_m, (tile // 128) * 128))
    # Never use a tile wider than the (128-rounded) problem size.
    tile = min(tile, max(128, _round_up(M, 128)))
    return int(tile)


def dynamic_conv_matmul(w_mat: jax.Array, cols: jax.Array) -> jax.Array:
    """Per-batch matmul: out[n] = w_mat @ cols[n].

    w_mat: (O, K), cols: (N, K, M)  ->  (N, O, M) float32.
    """
    O, K = w_mat.shape
    N, K2, M = cols.shape
    assert K == K2

    # bf16 operands (native MXU path), f32 accumulation inside the kernel.
    w_bf = w_mat.astype(jnp.bfloat16)
    cols_bf = cols.astype(jnp.bfloat16)

    tile_m = _choose_tile_m(O, K, M)
    m_tiles = pl.cdiv(M, tile_m)

    # Explicit scoped-VMEM budget (keeps 2-deep pipelining alive for big tiles).
    vmem_need = 2 * O * K * 2 + 2 * K * tile_m * 2 + 2 * O * tile_m * 4 + (2 << 20)
    vmem_limit = int(min(max(vmem_need, 8 << 20), 48 << 20))

    out = pl.pallas_call(
        _conv_mm_kernel,
        out_shape=jax.ShapeDtypeStruct((N, O, M), jnp.float32),
        grid_spec=pltpu.PrefetchScalarGridSpec(
            num_scalar_prefetch=0,
            grid=(N, m_tiles),
            in_specs=[
                # Weight stays resident (same block for every grid step).
                pl.BlockSpec((O, K), lambda n, j: (0, 0)),
                # Streamed lane-dense im2col column tile for batch n.
                pl.BlockSpec((None, K, tile_m), lambda n, j: (n, 0, j)),
            ],
            # Output written directly in (N, O, M) layout -> no post-transpose.
            out_specs=pl.BlockSpec((None, O, tile_m), lambda n, j: (n, 0, j)),
        ),
        compiler_params=pltpu.CompilerParams(
            dimension_semantics=("parallel", "parallel"),
            vmem_limit_bytes=vmem_limit,
        ),
    )(w_bf, cols_bf)
    return out


# ------------------------- DynamicConv2d forward --------------------------

def dynamic_conv_forward(x, weight, out_channel, kernel_size, stride, dilation):
    """Matches DynamicConv2d.forward: F.conv3d(x, weight[:out, :in], None,
    stride, same_padding(kernel_size), dilation, groups=1)."""
    N, C, D, H, W = x.shape
    k, s, dl = kernel_size, stride, dilation
    p = get_same_padding(k)
    O = out_channel

    # get_active_filter(out_channel, in_channel)
    w = weight[:out_channel, :C]  # (O, C, k, k, k)

    # Output spatial sizes (PyTorch conv formula).
    Do = (D + 2 * p - dl * (k - 1) - 1) // s + 1
    Ho = (H + 2 * p - dl * (k - 1) - 1) // s + 1
    Wo = (W + 2 * p - dl * (k - 1) - 1) // s + 1
    M = Do * Ho * Wo
    K = C * k ** 3

    if k == 1:
        # 1x1x1 conv (module default): p=0, im2col is a strided view + reshape.
        cols = x[:, :, ::s, ::s, ::s].reshape(N, C, M)
    else:
        # TODO(synk): for k>1, fuse im2col into the Pallas kernel (halo DMA
        # from HBM via memory_space=pl.ANY + a k^3 "arbitrary" reduction axis)
        # to avoid materializing the (K, M) matrix; the tested module default
        # (kernel_size=1) never hits this path.
        x_pad = jnp.pad(x, ((0, 0), (0, 0), (p, p), (p, p), (p, p)))
        patches = []
        for kd in range(k):
            for kh in range(k):
                for kw in range(k):
                    patches.append(
                        x_pad[:, :,
                              kd * dl: kd * dl + (Do - 1) * s + 1: s,
                              kh * dl: kh * dl + (Ho - 1) * s + 1: s,
                              kw * dl: kw * dl + (Wo - 1) * s + 1: s]
                    )  # each (N, C, Do, Ho, Wo)
        # (N, C, k^3, Do, Ho, Wo) -> (N, C*k^3, M); C-major/k-minor matches
        # w.reshape(O, C*k^3) row-major flattening.
        cols = jnp.stack(patches, axis=2).reshape(N, K, M)

    w_mat = w.reshape(O, K)                 # (O, K)
    y = dynamic_conv_matmul(w_mat, cols)    # (N, O, M) f32, MXU hot path
    y = y.reshape(N, O, Do, Ho, Wo).astype(x.dtype)
    return y


class DynamicConv2dPallas:
    """JAX/Pallas port of DynamicConv2d (nn.Conv3d inside, bias=False).
    Note: the module uses plain nn.Conv3d, so weight standardization is never
    applied in forward (isinstance(self.conv, WeightStandardConv2d) is False)."""

    def __init__(self, max_in_channels, max_out_channels, kernel_size=1,
                 stride=1, dilation=1, key=None):
        self.max_in_channels = max_in_channels
        self.max_out_channels = max_out_channels
        self.kernel_size = kernel_size
        self.stride = stride
        self.dilation = dilation
        self.active_out_channel = max_out_channels
        if key is None:
            key = jax.random.PRNGKey(0)
        # Deterministic init; shape matches nn.Conv3d weight (O, I, k, k, k).
        fan_in = max_in_channels * kernel_size ** 3
        bound = float(1.0 / (fan_in ** 0.5))
        self.weight = jax.random.uniform(
            key,
            (max_out_channels, max_in_channels,
             kernel_size, kernel_size, kernel_size),
            dtype=jnp.float32, minval=-bound, maxval=bound,
        )

    def __call__(self, x, out_channel=None):
        if out_channel is None:
            out_channel = self.active_out_channel
        return dynamic_conv_forward(
            x, self.weight, out_channel,
            self.kernel_size, self.stride, self.dilation,
        )


# ------------------------------- main --------------------------------------

if __name__ == "__main__":
    key = jax.random.PRNGKey(0)
    k_w, k_x, k_w2, k_x2 = jax.random.split(key, 4)

    def conv_ref(xx, ww, k, s, dl):
        p = get_same_padding(k)
        return lax.conv_general_dilated(
            xx, ww,
            window_strides=(s,) * 3,
            padding=[(p, p)] * 3,
            rhs_dilation=(dl,) * 3,
            dimension_numbers=("NCDHW", "OIDHW", "NCDHW"),
        )

    # ---- primary test: module defaults (kernel_size=1, stride=1, dilation=1) ----
    max_in, max_out = 8, 16
    module = DynamicConv2dPallas(max_in, max_out, kernel_size=1, stride=1,
                                 dilation=1, key=k_w)
    x = jax.random.normal(k_x, (2, 4, 4, 8, 8), dtype=jnp.float32)
    out_channel = 12  # exercise dynamic out-channel slicing
    y = jax.block_until_ready(module(x, out_channel=out_channel))

    w_act = module.weight[:out_channel, :x.shape[1]]
    # Reference on bf16-rounded operands (kernel feeds the MXU bf16, f32 acc).
    y_ref_q = conv_ref(x.astype(jnp.bfloat16).astype(jnp.float32),
                       w_act.astype(jnp.bfloat16).astype(jnp.float32), 1, 1, 1)
    # Full-precision reference with bf16-appropriate (looser) tolerance.
    y_ref_f = conv_ref(x, w_act, 1, 1, 1)
    assert y.shape == y_ref_f.shape, (y.shape, y_ref_f.shape)
    assert jnp.allclose(y, y_ref_q, atol=2e-3, rtol=2e-3), \
        float(jnp.max(jnp.abs(y - y_ref_q)))
    assert jnp.allclose(y, y_ref_f, atol=5e-2, rtol=5e-2), \
        float(jnp.max(jnp.abs(y - y_ref_f)))

    # ---- secondary test: k=3 path (im2col + ragged M tile handling) ----
    module3 = DynamicConv2dPallas(6, 10, kernel_size=3, stride=1,
                                  dilation=1, key=k_w2)
    x3 = jax.random.normal(k_x2, (2, 3, 4, 6, 6), dtype=jnp.float32)
    y3 = jax.block_until_ready(module3(x3, out_channel=5))

    w3 = module3.weight[:5, :x3.shape[1]]
    y3_ref_q = conv_ref(x3.astype(jnp.bfloat16).astype(jnp.float32),
                        w3.astype(jnp.bfloat16).astype(jnp.float32), 3, 1, 1)
    y3_ref_f = conv_ref(x3, w3, 3, 1, 1)
    assert y3.shape == y3_ref_f.shape, (y3.shape, y3_ref_f.shape)
    assert jnp.allclose(y3, y3_ref_q, atol=2e-3, rtol=2e-3), \
        float(jnp.max(jnp.abs(y3 - y3_ref_q)))
    assert jnp.allclose(y3, y3_ref_f, atol=5e-2, rtol=5e-2), \
        float(jnp.max(jnp.abs(y3 - y3_ref_f)))

    print("KERNEL_OK")
</pallas_src>

<mosaic_0001>
module attributes {stable_mosaic.version = 11 : i64} {
  func.func @_conv_mm_kernel(%arg0: i32, %arg1: i32, %arg2: memref<12x4xbf16, #tpu.memory_space<vmem>>, %arg3: memref<1x4x256xbf16, #tpu.memory_space<vmem>>, %arg4: memref<1x12x256xf32, #tpu.memory_space<vmem>>) attributes {dimension_semantics = [#tpu.dimension_semantics<parallel>, #tpu.dimension_semantics<parallel>], iteration_bounds = array<i64: 2, 1>, scalar_prefetch = 0 : i64, scratch_operands = 0 : i64, tpu.core_type = #tpu.core_type<tc>, window_params = [{pipeline_mode = #tpu.pipeline_mode<synchronous>, transform_indices = @transform_0, window_bounds = array<i64: 12, 4>}, {transform_indices = @transform_1, window_bounds = array<i64: 1, 4, 256>}, {transform_indices = @transform_2, window_bounds = array<i64: 1, 12, 256>}]} {
    %c0 = arith.constant 0 : index
    %c0_0 = arith.constant 0 : index
    %0 = vector.load %arg2[%c0, %c0_0] : memref<12x4xbf16, #tpu.memory_space<vmem>>, vector<12x4xbf16>
    %c0_1 = arith.constant 0 : index
    %c0_2 = arith.constant 0 : index
    %c0_3 = arith.constant 0 : index
    %1 = vector.load %arg3[%c0_1, %c0_2, %c0_3] : memref<1x4x256xbf16, #tpu.memory_space<vmem>>, vector<1x4x256xbf16>
    %2 = vector.shape_cast %1 : vector<1x4x256xbf16> to vector<4x256xbf16>
    %cst = arith.constant dense<0.000000e+00> : vector<12x256xf32>
    %3 = tpu.matmul %0, %2, %cst {dimension_numbers = #tpu.dot_dimension_numbers<[1], [0], [0], [1], [0, 0, 1, 1], [], []>} : vector<12x4xbf16>, vector<4x256xbf16>, vector<12x256xf32> -> vector<12x256xf32>
    %c0_4 = arith.constant 0 : index
    %c0_5 = arith.constant 0 : index
    %c0_6 = arith.constant 0 : index
    %4 = vector.load %arg4[%c0_4, %c0_5, %c0_6] : memref<1x12x256xf32, #tpu.memory_space<vmem>>, vector<1x12x256xf32>
    %5 = vector.shape_cast %4 : vector<1x12x256xf32> to vector<12x256xf32>
    %6 = vector.shape_cast %3 : vector<12x256xf32> to vector<1x12x256xf32>
    tpu.vector_store %arg4[%c0_4, %c0_5, %c0_6], %6 {strides = array<i32>} : memref<1x12x256xf32, #tpu.memory_space<vmem>>, vector<1x12x256xf32>,
    return
  }
  func.func @transform_0(%arg0: i32, %arg1: i32) -> (i32, i32) {
    %c0_i32 = arith.constant 0 : i32
    %c0_i32_0 = arith.constant 0 : i32
    %c0_i32_1 = arith.constant 0 : i32
    return %c0_i32, %c0_i32_0 : i32, i32
  }
  func.func @transform_1(%arg0: i32, %arg1: i32) -> (i32, i32, i32) {
    %c0_i32 = arith.constant 0 : i32
    %c0_i32_0 = arith.constant 0 : i32
    return %arg0, %c0_i32, %arg1 : i32, i32, i32
  }
  func.func @transform_2(%arg0: i32, %arg1: i32) -> (i32, i32, i32) {
    %c0_i32 = arith.constant 0 : i32
    %c0_i32_0 = arith.constant 0 : i32
    return %arg0, %c0_i32, %arg1 : i32, i32, i32
  }
}

</mosaic_0001>

<bundles_post_ra>
// kernel: tpu_custom_call.1
= control target key start
LH: loop header
LB: loop body
LE: loop exit
PB: predicated region body
PF: predicated region fallthrough
CT: control target
= control target key end

     0   :  { %s429_s9 = smov 0   ;;  %s431_s10 = smov 0   ;;  %s465_s0 = inlined_call_operand.vmem [shape: bf16[12,4], index: 0, kind: input, shape index: {}]   ;;  %s466_s1 = inlined_call_operand.vmem [shape: bf16[2,4,256], index: 1, kind: input, shape index: {}]   ;;  %s467_s2 = inlined_call_operand.vmem [shape: f32[2,12,256], index: 2, kind: output, shape index: {}]  }
   0x1   :  { %s433_s11 = smov 0  }
   0x2 LB: > { %s24_s12 = sadd.s32 1, %s407_s10  ;;  %p350_p0 = scmp.ge.s32.totalorder %s411_s11, 1  ;;  %s411_s11 = sphi %s433_s11, %s12_s11   ;;  %s407_s10 = sphi %s431_s10, %s469_s10   ;;  %s403_s9 = sphi %s429_s9, %s468_s9  }
   0x3   : > { %p26_p1 = scmp.ge.s32.totalorder %s24_s12, 2  ;;  %p133_p2 = scmp.lt.s32.totalorder %s411_s11, 3 }
   0x5   : > { %s471_s12 = smov (%p26_p1, %s24_s12), 0  ;;  %p134_p3 = pnand %p350_p0, %p133_p2 }
   0x6   : > { %p164_p4 = scmp.lt.s32.totalorder (!%p134_p3), %s403_s9, 1  ;;  %v413_v0 = vmov (!%p134_p3), 0   ;;  %vm205_vm0 = vcmask (!%p134_p3), 1041408   ;;  %v388_v4 = vld [vmem:[%s465_s0] sm:$0x3f] (!%p134_p3)   ;;  %vm201_vm1 = vcmask (!%p134_p3), 31744  }
   0x7   : > { %137 = sbr.rel (%p134_p3) target bundleno = 240 (0xf0), region = 28  ;;  %244 = vmatprep.mubr.bf16.mxu0 (!%p134_p3), %v413_v0 }
   0xe   : > { %s473_s9 = smov (!%p164_p4, %s403_s9), 1 }
   0xf   : > { %s361_s13 = sshll.u32 %s473_s9, 2  ;;  %s362_s19 = sshll.u32 %s473_s9, 5 }
  0x10   : > { %s171_s16 = scalar_lea.vmem %s466_s1, %s361_s13  ;;  %s181_s22 = scalar_lea.vmem %s467_s2, %s362_s19 }
  0x11   : > { %v356_v1 = vld.sshfl [vmem:[%s171_s16] sm:$0x33 pattern:$0x76325410] }
  0x12   : > { %v200_v2 = vcombine.high %v356_v1, %v356_v1  ;;  %v207_v3 = vsel %vm205_vm0, %v356_v1, 0 }
  0x14   : > { %357 = vmatprep.subr.msk.bf16.mxu0 %vm205_vm0, %v200_v2 }
  0x15   : > { %213 = vmatpush1.bf16.msra.mxu0 %v207_v3 }
  0x18   : > { %358 = vmatmul.mubr.msk.bf16.vlgmr.msra.gmra.mrb[0].mxu0 %vm201_vm1, %v388_v4 }
  0xeb   : > { %v246_v5 = vpop.f32.mrb[0].mxu0 }
  0xec   : > { %255 = vst [vmem:[%s181_s22] sm:$0xff] %v246_v5  ;;  %v248_v6 = vpop.f32.mrb[1].mxu0 }
  0xed   : > { %256 = vst [vmem:[%s181_s22 + $0x8] sm:$0xff] %v248_v6  ;;  %v250_v7 = vpop.f32.mrb[2].mxu0 }
  0xee   : > { %257 = vst [vmem:[%s181_s22 + $0x10] sm:$0xf] %v250_v7  ;;  %v252_v8 = vpop.f32.mrb[3].mxu0 }
  0xef   : > { %258 = vst [vmem:[%s181_s22 + $0x18] sm:$0xf] %v252_v8 }
  0xf0 PF: > { %s12_s11 = sadd.s32 1, %s411_s11   ;;  %s468_s9 = smov %s407_s10 }
  0xf1   : > { %p9_p5 = scmp.ge.s32.totalorder %s12_s11, 4   ;;  %s469_s10 = smov %s471_s12 }
  0xf3   :  { %11 = sbr.rel (!%p9_p5) target bundleno = 2 (0x2), region = 58 }

</bundles_post_ra>
